<compile_context>
chip_gen: v6e
topology: v6e:2x2x1
jax: 0.10.0
libtpu: 0.0.40
codegen_flags: <defaults>
</compile_context>

<pallas_src>
import functools
import types

import jax
import jax.numpy as jnp
from jax.experimental import pallas as pl
from jax.experimental.pallas import tpu as pltpu

_LANES = 128
_SUBLANES = 8


def _round_up(x, m):
    return (x + m - 1) // m * m


# ----------------------------------------------------------------------------- HW info
def _hw_info():
    kind = ""
    try:
        kind = jax.devices()[0].device_kind.lower()
    except Exception:
        pass
    vmem_cap = None
    try:
        vmem_cap = int(pltpu.get_tpu_info().vmem_capacity_bytes)
    except Exception:
        vmem_cap = None
    if vmem_cap is None or vmem_cap <= 0:
        vmem_cap = 64 * 2 ** 20 if "v7" in kind else 128 * 2 ** 20

    if vmem_cap <= 64 * 2 ** 20:
        limit_cap = (vmem_cap * 3) // 4          # v7x: leave 25% for Mosaic scratch/spill
    else:
        limit_cap = min(100 * 2 ** 20, vmem_cap - 28 * 2 ** 20)   # v5e/v6e: 128 MiB physical

    old_gen = any(v in kind for v in ("v2", "v3", "v4", "v5"))
    return types.SimpleNamespace(
        kind=kind,
        vmem_cap=vmem_cap,
        limit_cap=limit_cap,
        pick_budget=(limit_cap * 3) // 4,            # margin: the estimate is approximate
        target_rows=256 if old_gen else 512,         # fill 128- vs 256-wide MXU rows
        min_grid_steps=2 if "v7" in kind else 1,     # v7x: 2 TCs share the parallel axis
    )


# -------------------------------------------------------------------------- size heuristics
def _attn_per_elem_bytes(L, Lc, D, out_cols, itemsize):
    """VMEM bytes per batch element of the attention stage: double-buffered I/O tiles
    plus the f32 score/aligned/u intermediates (previously under-counted)."""
    d_pad = _round_up(D, _LANES)
    lc_pad = _round_up(Lc, _LANES)
    l_pad = _round_up(L, _SUBLANES)
    return (2 * l_pad * d_pad * itemsize                        # input block
            + 2 * _round_up(Lc, _SUBLANES) * d_pad * itemsize   # context block
            + 2 * _SUBLANES * lc_pad * 4                        # (1,Lc) mask tile -> (8, lc_pad)
            + 2 * _round_up(out_cols, _LANES) * 4               # f32 output rows
            + (3 * l_pad * lc_pad + 3 * l_pad * d_pad) * 4)     # align/exp/sm + aligned/u


def _weight_bytes(D, Cp, itemsize, with_classifier):
    d_pad = _round_up(D, _LANES)
    b = D * d_pad * itemsize + 2 * _SUBLANES * d_pad * 4        # attn.W^T + attn.b + contx row
    if with_classifier:
        b += D * d_pad * itemsize + _SUBLANES * d_pad * 4       # cls1.W^T + cls1.b
        b += D * Cp * itemsize + _SUBLANES * Cp * 4             # cls2.W^T + cls2.b
    return b


def _pick_batch_tile(batch, rows_per_elem, per_elem_bytes, fixed_bytes, budget,
                     target_rows, min_steps):
    """Largest divisor of `batch` whose footprint fits the VMEM budget, stopping once
    the flattened MXU row count is filled; keeps >= min_steps grid steps (v7x megacore)."""
    avail = max(budget - fixed_bytes, per_elem_bytes)
    max_tb = max(1, avail // per_elem_bytes)
    if min_steps > 1 and batch >= min_steps:
        max_tb = min(max_tb, batch // min_steps)
    best = 1
    for t in range(1, batch + 1):
        if batch % t:
            continue
        if t > max_tb:
            break
        best = t
        if t * rows_per_elem >= target_rows:
            break
    return best


# ----------------------------------------------------------------------------- kernels
def _recip(x, approx):
    # Exact division on the f32 path; approximate EUP reciprocal only for bf16 compute.
    return pl.reciprocal(x, approx=True) if approx else 1.0 / x


def _attention_pool(inp_ref, ctx_ref, mask01_ref, attn_wt_ref, attn_b_ref,
                    contx_row_ref, *, approx_recip):
    """align_to_context + attn/tanh/contx masked-softmax pooling. Returns (TB, D) f32."""
    TB, L, D = inp_ref.shape
    Lc = ctx_ref.shape[1]

    x = inp_ref[...]                      # (TB, L, D)  compute dtype (bf16 default)
    c = ctx_ref[...]                      # (TB, Lc, D) compute dtype

    # Lane-dense (TB, 1, Lc) {0,1} mask -> (TB, L, 1) additive 0/-inf row-mask column.
    # Diagonal extraction (iota multiply + lane reduce) rather than a lane->sublane
    # relayout; every op here is natively supported.  Requires L == Lc, exactly like
    # the reference masked_fill broadcast.
    # TODO(synk): swap for a direct mask01[:, 0, :, None] relayout once Mosaic reshape
    # support for trailing-unit-dim expansion is confirmed on all target generations.
    mask01 = mask01_ref[...]                                           # (TB, 1, Lc) f32
    li = jax.lax.broadcasted_iota(jnp.int32, (L, Lc), 0)
    ki = jax.lax.broadcasted_iota(jnp.int32, (L, Lc), 1)
    eye = (li == ki).astype(jnp.float32)                               # (L, Lc)
    row01 = jnp.sum(mask01 * eye[None, :, :], axis=2, keepdims=True)   # (TB, L, 1)
    bias_col = jnp.where(row01 > 0.5, jnp.float32(-jnp.inf), jnp.float32(0.0))

    # ---------- align_to_context: bmm -> row mask -> softmax(ctx axis) -> bmm ----------
    # TODO(synk): check the MLIR for a per-step vxpose of the (Lc, D) context operand;
    # if it shows up on the critical path, feed ctx^T from the wrapper instead.
    align = jnp.einsum("bld,bkd->blk", x, c,
                       preferred_element_type=jnp.float32)             # (TB, L, Lc) f32
    align = align + bias_col                # faithful row mask (NaN rows when masked)
    align = align - jnp.max(align, axis=2, keepdims=True)
    ae = jnp.exp(align)
    attn_sm = ae * _recip(jnp.sum(ae, axis=2, keepdims=True), approx_recip)
    aligned = jnp.einsum("blk,bkd->bld", attn_sm.astype(c.dtype), c,
                         preferred_element_type=jnp.float32)            # (TB, L, D) f32

    # ---------- pooling: attn Linear -> tanh -> contx (N=1: VPU) -> masked softmax(L) ----------
    a_flat = aligned.reshape(TB * L, D)                # flatten to fill MXU rows
    u = jnp.tanh(jnp.dot(a_flat.astype(attn_wt_ref.dtype), attn_wt_ref[...],
                         preferred_element_type=jnp.float32) + attn_b_ref[...])
    s = jnp.sum(u * contx_row_ref[...], axis=-1, keepdims=True)         # (TB*L, 1)
    s = s.reshape(TB, L, 1) + bias_col
    s = s - jnp.max(s, axis=1, keepdims=True)
    se = jnp.exp(s)
    alpha = se * _recip(jnp.sum(se, axis=1, keepdims=True), approx_recip)
    return jnp.sum(alpha * aligned, axis=1)                              # (TB, D) f32


def _mlp_classifier(pooled_f32, cls1_wt_ref, cls1_b_ref, cls2_wt_ref, cls2_b_ref):
    h = jnp.dot(pooled_f32.astype(cls1_wt_ref.dtype), cls1_wt_ref[...],
                preferred_element_type=jnp.float32) + cls1_b_ref[...]
    h = jnp.maximum(h, 0.0)                 # ReLU; Dropout is eval-mode identity
    return jnp.dot(h.astype(cls2_wt_ref.dtype), cls2_wt_ref[...],
                   preferred_element_type=jnp.float32) + cls2_b_ref[...]


def _fused_kernel(inp_ref, ctx_ref, mask01_ref, attn_wt_ref, attn_b_ref, contx_row_ref,
                  cls1_wt_ref, cls1_b_ref, cls2_wt_ref, cls2_b_ref, out_ref,
                  *, approx_recip):
    pooled = _attention_pool(inp_ref, ctx_ref, mask01_ref, attn_wt_ref, attn_b_ref,
                             contx_row_ref, approx_recip=approx_recip)
    out = _mlp_classifier(pooled, cls1_wt_ref, cls1_b_ref, cls2_wt_ref, cls2_b_ref)
    out_ref[...] = out[None, :, :].astype(out_ref.dtype)       # one dense (1, tb, Cp) store


def _pool_kernel(inp_ref, ctx_ref, mask01_ref, attn_wt_ref, attn_b_ref, contx_row_ref,
                 pooled_ref, *, approx_recip):
    pooled = _attention_pool(inp_ref, ctx_ref, mask01_ref, attn_wt_ref, attn_b_ref,
                             contx_row_ref, approx_recip=approx_recip)
    pooled_ref[...] = pooled[None, :, :].astype(pooled_ref.dtype)


def _classifier_kernel(pooled_ref, cls1_wt_ref, cls1_b_ref, cls2_wt_ref, cls2_b_ref,
                       out_ref):
    p = pooled_ref[...][0]                                      # (TR, D) f32
    out = _mlp_classifier(p, cls1_wt_ref, cls1_b_ref, cls2_wt_ref, cls2_b_ref)
    out_ref[...] = out[None, :, :].astype(out_ref.dtype)


# ----------------------------------------------------------------------------- wrapper
def att_classifier_forward(inp, ctx, mask, params, *, compute_dtype=jnp.bfloat16,
                           tb=None, split_classifier=None):
    B, L, D = inp.shape
    Lc = ctx.shape[1]
    C = params["cls2_w"].shape[0]
    assert L == Lc, "reference masked_fill broadcast requires input_len == context_len"

    hw = _hw_info()
    itemsize = jnp.dtype(compute_dtype).itemsize
    approx_recip = jnp.dtype(compute_dtype) != jnp.dtype(jnp.float32)
    Cp = _round_up(max(C, 1), _LANES)        # lane-dense padded class dim (unmasked stores)

    fused_weight_bytes = _weight_bytes(D, Cp, itemsize, with_classifier=True)
    if split_classifier is None:
        # Split the classifier out once the fused resident weights eat a big VMEM chunk
        # (large D); the split also gives B-row instead of tb-row MXU fill for cls1/cls2.
        split_classifier = fused_weight_bytes > hw.pick_budget // 3

    attn_weight_bytes = _weight_bytes(D, Cp, itemsize, with_classifier=not split_classifier)
    out_cols = D if split_classifier else Cp
    per_elem = _attn_per_elem_bytes(L, Lc, D, out_cols, itemsize)

    if tb is None:
        tb = _pick_batch_tile(B, L, per_elem, attn_weight_bytes, hw.pick_budget,
                              hw.target_rows, hw.min_grid_steps)
    assert B % tb == 0, "tb must divide the batch size"
    grid_b = B // tb

    # ---- glue (plain JAX): dtype casts, transposes, padding, {0,1} mask ----
    x = inp.astype(compute_dtype)
    c = ctx.astype(compute_dtype)
    # torch masked_fill uses mask.bool(): any nonzero entry masks the whole row.
    mask01 = (mask.astype(jnp.float32) != 0.0).astype(jnp.float32).reshape(B, 1, Lc)

    attn_wt = params["attn_w"].T.astype(compute_dtype)                 # (D, D)
    attn_b = params["attn_b"].reshape(1, D).astype(jnp.float32)
    contx_row = params["contx_w"].reshape(1, D).astype(jnp.float32)    # VPU path stays f32
    cls1_wt = params["cls1_w"].T.astype(compute_dtype)                 # (D, D)
    cls1_b = params["cls1_b"].reshape(1, D).astype(jnp.float32)
    cls2_wt = jnp.zeros((D, Cp), compute_dtype).at[:, :C].set(
        params["cls2_w"].T.astype(compute_dtype))                      # (D, Cp) lane padded
    cls2_b = jnp.zeros((1, Cp), jnp.float32).at[:, :C].set(
        params["cls2_b"].astype(jnp.float32))

    def _limit(est):
        # Always set (v5e default scoped VMEM is only 16 MiB); never below the 32 MiB
        # default, capped per generation (48 MiB v7x, ~100 MiB v5e/v6e).
        return int(min(max(est * 3 // 2, 32 * 2 ** 20), hw.limit_cap))

    def _resident(shape, single):
        n = len(shape)
        idx = lambda *_: (0,) * n
        if single and hasattr(pl, "Buffered"):
            # Constant-index weights are never re-DMAed; one buffer halves their VMEM.
            return pl.BlockSpec(shape, idx, pipeline_mode=pl.Buffered(1))
        return pl.BlockSpec(shape, idx)

    def _run(single):
        wbuf = 1 if single else 2
        attn_in_specs = [
            pl.BlockSpec((tb, L, D), lambda b: (b, 0, 0)),     # input
            pl.BlockSpec((tb, Lc, D), lambda b: (b, 0, 0)),    # context
            pl.BlockSpec((tb, 1, Lc), lambda b: (b, 0, 0)),    # lane-dense {0,1} row mask
            _resident((D, D), single),                         # attn.weight^T
            _resident((1, D), single),                         # attn.bias
            _resident((1, D), single),                         # contx.weight row
        ]
        attn_params = pltpu.CompilerParams(
            dimension_semantics=("parallel",),
            vmem_limit_bytes=_limit(tb * per_elem + wbuf * attn_weight_bytes))

        if not split_classifier:
            in_specs = attn_in_specs + [
                _resident((D, D), single), _resident((1, D), single),
                _resident((D, Cp), single), _resident((1, Cp), single)]
            out = pl.pallas_call(
                functools.partial(_fused_kernel, approx_recip=approx_recip),
                out_shape=jax.ShapeDtypeStruct((grid_b, tb, Cp), jnp.float32),
                grid_spec=pltpu.PrefetchScalarGridSpec(
                    num_scalar_prefetch=0, grid=(grid_b,),
                    in_specs=in_specs,
                    out_specs=pl.BlockSpec((1, tb, Cp), lambda b: (b, 0, 0))),
                compiler_params=attn_params,
            )(x, c, mask01, attn_wt, attn_b, contx_row,
              cls1_wt, cls1_b, cls2_wt, cls2_b)
            return out.reshape(B, Cp)

        # ---- split path: attention/pool kernel, then classifier kernel (B-row fill) ----
        pooled = pl.pallas_call(
            functools.partial(_pool_kernel, approx_recip=approx_recip),
            out_shape=jax.ShapeDtypeStruct((grid_b, tb, D), jnp.float32),
            grid_spec=pltpu.PrefetchScalarGridSpec(
                num_scalar_prefetch=0, grid=(grid_b,),
                in_specs=attn_in_specs,
                out_specs=pl.BlockSpec((1, tb, D), lambda b: (b, 0, 0))),
            compiler_params=attn_params,
        )(x, c, mask01, attn_wt, attn_b, contx_row)
        pooled = pooled.reshape(B, D)

        cls_weight_bytes = (_weight_bytes(D, Cp, itemsize, True)
                            - _weight_bytes(D, Cp, itemsize, False))
        d_pad = _round_up(D, _LANES)
        cls_per_row = 2 * d_pad * 4 + 2 * Cp * 4 + (d_pad + Cp) * 4
        tr = _pick_batch_tile(B, 1, cls_per_row, cls_weight_bytes, hw.pick_budget,
                              hw.target_rows, hw.min_grid_steps)
        cls_params = pltpu.CompilerParams(
            dimension_semantics=("parallel",),
            vmem_limit_bytes=_limit(tr * cls_per_row + wbuf * cls_weight_bytes))
        out = pl.pallas_call(
            _classifier_kernel,
            out_shape=jax.ShapeDtypeStruct((B // tr, tr, Cp), jnp.float32),
            grid_spec=pltpu.PrefetchScalarGridSpec(
                num_scalar_prefetch=0, grid=(B // tr,),
                in_specs=[pl.BlockSpec((1, tr, D), lambda b: (b, 0, 0)),
                          _resident((D, D), single), _resident((1, D), single),
                          _resident((D, Cp), single), _resident((1, Cp), single)],
                out_specs=pl.BlockSpec((1, tr, Cp), lambda b: (b, 0, 0))),
            compiler_params=cls_params,
        )(pooled.reshape(B // tr, tr, D), cls1_wt, cls1_b, cls2_wt, cls2_b)
        return out.reshape(B, Cp)

    if hasattr(pl, "Buffered"):
        try:
            return _run(True)[:, :C]
        except (TypeError, NotImplementedError, ValueError, pltpu.LoweringException):
            # Only the pl.Buffered(1) single-buffering experiment is retried; the
            # double-buffered retry is otherwise identical, so genuine errors re-raise.
            pass
    return _run(False)[:, :C]


# --------------------------------------------------------------------- reference & params
def _reference(inp, ctx, mask, params):
    """Pure-JAX f32 reference of the same pipeline (for correctness check)."""
    B, L, D = inp.shape
    Lc = ctx.shape[1]
    align = jnp.einsum("bld,bkd->blk", inp, ctx)
    row_masked = (mask != 0).reshape(B, Lc, 1)
    align = jnp.where(row_masked, -jnp.inf, align)
    attn = jax.nn.softmax(align, axis=2)
    aligned = jnp.einsum("blk,bkd->bld", attn, ctx)
    u = jnp.tanh(aligned @ params["attn_w"].T + params["attn_b"])
    s = u @ params["contx_w"].T
    s = jnp.where(row_masked, -jnp.inf, s)
    alpha = jax.nn.softmax(s, axis=1)
    pooled = jnp.sum(alpha * aligned, axis=1)
    h = jax.nn.relu(pooled @ params["cls1_w"].T + params["cls1_b"])
    return h @ params["cls2_w"].T + params["cls2_b"]


def init_params(key, in_feature, class_num=1):
    ks = jax.random.split(key, 6)
    scale = 0.1
    return {
        "attn_w": scale * jax.random.normal(ks[0], (in_feature, in_feature), jnp.float32),
        "attn_b": scale * jax.random.normal(ks[1], (in_feature,), jnp.float32),
        "contx_w": scale * jax.random.normal(ks[2], (1, in_feature), jnp.float32),
        "cls1_w": scale * jax.random.normal(ks[3], (in_feature, in_feature), jnp.float32),
        "cls1_b": scale * jax.random.normal(ks[4], (in_feature,), jnp.float32),
        "cls2_w": scale * jax.random.normal(ks[5], (class_num, in_feature), jnp.float32),
        "cls2_b": jnp.zeros((class_num,), jnp.float32),
    }


if __name__ == "__main__":
    B, L, D, C = 4, 8, 32, 3   # batch, seq (input_len == context_len), in_feature, class_num

    key = jax.random.PRNGKey(0)
    k_in, k_ctx, k_par = jax.random.split(key, 3)
    inp = jax.random.normal(k_in, (B, L, D), jnp.float32)
    ctx = jax.random.normal(k_ctx, (B, L, D), jnp.float32)
    # Zero mask (no positions masked): any nonzero mask entry makes the reference emit a
    # NaN row (softmax of an all -inf row), which the kernel reproduces but which would
    # make a numeric comparison impossible.
    mask = jnp.zeros((B, L), jnp.float32)
    params = init_params(k_par, D, C)

    ref = _reference(inp, ctx, mask, params)

    # f32 fused path (exact reciprocals): tight structural check.
    out_f32 = jax.block_until_ready(
        att_classifier_forward(inp, ctx, mask, params, compute_dtype=jnp.float32))
    assert out_f32.shape == (B, C)
    assert jnp.allclose(out_f32, ref, rtol=5e-3, atol=5e-3), (out_f32, ref)

    # f32 fused path with an explicit multi-step grid (tb < B).
    out_grid = jax.block_until_ready(
        att_classifier_forward(inp, ctx, mask, params, compute_dtype=jnp.float32, tb=2))
    assert jnp.allclose(out_grid, ref, rtol=5e-3, atol=5e-3), (out_grid, ref)

    # bf16 MXU path (default heuristics): looser tolerance for bf16 operand rounding.
    out_bf16 = jax.block_until_ready(att_classifier_forward(inp, ctx, mask, params))
    assert out_bf16.shape == (B, C)
    assert jnp.allclose(out_bf16, ref, rtol=5e-2, atol=5e-2), (out_bf16, ref)

    # Split-classifier path (pool kernel + classifier kernel), forced on small shapes so
    # the large-D code path is exercised too.
    out_split = jax.block_until_ready(
        att_classifier_forward(inp, ctx, mask, params, split_classifier=True))
    assert out_split.shape == (B, C)
    assert jnp.allclose(out_split, ref, rtol=5e-2, atol=5e-2), (out_split, ref)

    print("KERNEL_OK")
</pallas_src>

<mosaic_0001>
module attributes {stable_mosaic.version = 11 : i64} {
  func.func @_fused_kernel(%arg0: i32, %arg1: memref<4x8x32xf32, #tpu.memory_space<vmem>>, %arg2: memref<4x8x32xf32, #tpu.memory_space<vmem>>, %arg3: memref<4x1x8xf32, #tpu.memory_space<vmem>>, %arg4: memref<32x32xf32, #tpu.memory_space<vmem>>, %arg5: memref<1x32xf32, #tpu.memory_space<vmem>>, %arg6: memref<1x32xf32, #tpu.memory_space<vmem>>, %arg7: memref<32x32xf32, #tpu.memory_space<vmem>>, %arg8: memref<1x32xf32, #tpu.memory_space<vmem>>, %arg9: memref<32x128xf32, #tpu.memory_space<vmem>>, %arg10: memref<1x128xf32, #tpu.memory_space<vmem>>, %arg11: memref<1x4x128xf32, #tpu.memory_space<vmem>>) attributes {dimension_semantics = [#tpu.dimension_semantics<parallel>], iteration_bounds = array<i64: 1>, scalar_prefetch = 0 : i64, scratch_operands = 0 : i64, tpu.core_type = #tpu.core_type<tc>, window_params = [{transform_indices = @transform_0, window_bounds = array<i64: 4, 8, 32>}, {transform_indices = @transform_1, window_bounds = array<i64: 4, 8, 32>}, {transform_indices = @transform_2, window_bounds = array<i64: 4, 1, 8>}, {pipeline_mode = #tpu.pipeline_mode<synchronous>, transform_indices = @transform_3, window_bounds = array<i64: 32, 32>}, {pipeline_mode = #tpu.pipeline_mode<synchronous>, transform_indices = @transform_4, window_bounds = array<i64: 1, 32>}, {pipeline_mode = #tpu.pipeline_mode<synchronous>, transform_indices = @transform_5, window_bounds = array<i64: 1, 32>}, {pipeline_mode = #tpu.pipeline_mode<synchronous>, transform_indices = @transform_6, window_bounds = array<i64: 32, 32>}, {pipeline_mode = #tpu.pipeline_mode<synchronous>, transform_indices = @transform_7, window_bounds = array<i64: 1, 32>}, {pipeline_mode = #tpu.pipeline_mode<synchronous>, transform_indices = @transform_8, window_bounds = array<i64: 32, 128>}, {pipeline_mode = #tpu.pipeline_mode<synchronous>, transform_indices = @transform_9, window_bounds = array<i64: 1, 128>}, {transform_indices = @transform_10, window_bounds = array<i64: 1, 4, 128>}]} {
    %c0 = arith.constant 0 : index
    %c0_0 = arith.constant 0 : index
    %c0_1 = arith.constant 0 : index
    %0 = vector.load %arg1[%c0, %c0_0, %c0_1] : memref<4x8x32xf32, #tpu.memory_space<vmem>>, vector<4x8x32xf32>
    %c0_2 = arith.constant 0 : index
    %c0_3 = arith.constant 0 : index
    %c0_4 = arith.constant 0 : index
    %1 = vector.load %arg2[%c0_2, %c0_3, %c0_4] : memref<4x8x32xf32, #tpu.memory_space<vmem>>, vector<4x8x32xf32>
    %c0_5 = arith.constant 0 : index
    %c0_6 = arith.constant 0 : index
    %c0_7 = arith.constant 0 : index
    %2 = vector.load %arg3[%c0_5, %c0_6, %c0_7] : memref<4x1x8xf32, #tpu.memory_space<vmem>>, vector<4x1x8xf32>
    %3 = tpu.iota {dimensions = array<i32: 0>} : vector<8x8xi32>
    %4 = tpu.iota {dimensions = array<i32: 1>} : vector<8x8xi32>
    %5 = arith.cmpi eq, %3, %4 : vector<8x8xi32>
    %6 = arith.extui %5 : vector<8x8xi1> to vector<8x8xi32>
    %7 = arith.sitofp %6 : vector<8x8xi32> to vector<8x8xf32>
    %8 = vector.shape_cast %7 : vector<8x8xf32> to vector<1x8x8xf32>
    %9 = vector.broadcast %2 : vector<4x1x8xf32> to vector<4x8x8xf32>
    %10 = vector.broadcast %8 : vector<1x8x8xf32> to vector<4x8x8xf32>
    %11 = arith.mulf %9, %10 : vector<4x8x8xf32>
    %cst = arith.constant dense<0.000000e+00> : vector<4x8xf32>
    %12 = vector.multi_reduction <add>, %11, %cst [2] : vector<4x8x8xf32> to vector<4x8xf32>
    %13 = vector.shape_cast %12 : vector<4x8xf32> to vector<4x8x1xf32>
    %cst_8 = arith.constant 5.000000e-01 : f32
    %14 = vector.broadcast %cst_8 : f32 to vector<4x8x1xf32>
    %15 = arith.cmpf ogt, %13, %14 : vector<4x8x1xf32>
    %cst_9 = arith.constant 0xFF800000 : f32
    %cst_10 = arith.constant 0.000000e+00 : f32
    %16 = vector.broadcast %cst_9 : f32 to vector<4x8x1xf32>
    %17 = vector.broadcast %cst_10 : f32 to vector<4x8x1xf32>
    %18 = arith.select %15, %16, %17 : vector<4x8x1xi1>, vector<4x8x1xf32>
    "tpu.trace_start"() <{level = 10 : i32, message = "bld,bkd->blk"}> : () -> ()
    %cst_11 = arith.constant dense<0.000000e+00> : vector<4x8x8xf32>
    %19 = tpu.matmul %0, %1, %cst_11 {dimension_numbers = #tpu.dot_dimension_numbers<[2], [2], [1], [1], [0, 0, 0, 1, 1, 1], [0], [0]>} : vector<4x8x32xf32>, vector<4x8x32xf32>, vector<4x8x8xf32> -> vector<4x8x8xf32>
    "tpu.trace_stop"() : () -> ()
    %20 = vector.broadcast %18 : vector<4x8x1xf32> to vector<4x8x8xf32>
    %21 = arith.addf %19, %20 : vector<4x8x8xf32>
    %cst_12 = arith.constant dense<0xFF800000> : vector<4x8xf32>
    %22 = vector.multi_reduction <maximumf>, %21, %cst_12 [2] : vector<4x8x8xf32> to vector<4x8xf32>
    %23 = vector.shape_cast %22 : vector<4x8xf32> to vector<4x8x1xf32>
    %24 = vector.broadcast %23 : vector<4x8x1xf32> to vector<4x8x8xf32>
    %25 = arith.subf %21, %24 : vector<4x8x8xf32>
    %26 = math.exp %25 : vector<4x8x8xf32>
    %cst_13 = arith.constant dense<0.000000e+00> : vector<4x8xf32>
    %27 = vector.multi_reduction <add>, %26, %cst_13 [2] : vector<4x8x8xf32> to vector<4x8xf32>
    %28 = vector.shape_cast %27 : vector<4x8xf32> to vector<4x8x1xf32>
    %cst_14 = arith.constant 1.000000e+00 : f32
    %29 = vector.broadcast %cst_14 : f32 to vector<4x8x1xf32>
    %30 = arith.divf %29, %28 : vector<4x8x1xf32>
    %31 = vector.broadcast %30 : vector<4x8x1xf32> to vector<4x8x8xf32>
    %32 = arith.mulf %26, %31 : vector<4x8x8xf32>
    "tpu.trace_start"() <{level = 10 : i32, message = "blk,bkd->bld"}> : () -> ()
    %cst_15 = arith.constant dense<0.000000e+00> : vector<4x8x32xf32>
    %33 = tpu.matmul %32, %1, %cst_15 {dimension_numbers = #tpu.dot_dimension_numbers<[2], [1], [1], [2], [0, 0, 0, 1, 1, 2], [0], [0]>} : vector<4x8x8xf32>, vector<4x8x32xf32>, vector<4x8x32xf32> -> vector<4x8x32xf32>
    "tpu.trace_stop"() : () -> ()
    %34 = vector.shape_cast %33 : vector<4x8x32xf32> to vector<32x32xf32>
    %c0_16 = arith.constant 0 : index
    %c0_17 = arith.constant 0 : index
    %35 = vector.load %arg4[%c0_16, %c0_17] : memref<32x32xf32, #tpu.memory_space<vmem>>, vector<32x32xf32>
    %cst_18 = arith.constant dense<0.000000e+00> : vector<32x32xf32>
    %36 = tpu.matmul %34, %35, %cst_18 {dimension_numbers = #tpu.dot_dimension_numbers<[1], [0], [0], [1], [0, 0, 1, 1], [], []>} : vector<32x32xf32>, vector<32x32xf32>, vector<32x32xf32> -> vector<32x32xf32>
    %c0_19 = arith.constant 0 : index
    %c0_20 = arith.constant 0 : index
    %37 = vector.load %arg5[%c0_19, %c0_20] : memref<1x32xf32, #tpu.memory_space<vmem>>, vector<1x32xf32>
    %38 = vector.broadcast %37 : vector<1x32xf32> to vector<32x32xf32>
    %39 = arith.addf %36, %38 : vector<32x32xf32>
    %40 = math.tanh %39 : vector<32x32xf32>
    %c0_21 = arith.constant 0 : index
    %c0_22 = arith.constant 0 : index
    %41 = vector.load %arg6[%c0_21, %c0_22] : memref<1x32xf32, #tpu.memory_space<vmem>>, vector<1x32xf32>
    %42 = vector.broadcast %41 : vector<1x32xf32> to vector<32x32xf32>
    %43 = arith.mulf %40, %42 : vector<32x32xf32>
    %cst_23 = arith.constant dense<0.000000e+00> : vector<32xf32>
    %44 = vector.multi_reduction <add>, %43, %cst_23 [1] : vector<32x32xf32> to vector<32xf32>
    %45 = vector.shape_cast %44 : vector<32xf32> to vector<32x1xf32>
    %46 = vector.shape_cast %45 : vector<32x1xf32> to vector<4x8x1xf32>
    %47 = arith.addf %46, %18 : vector<4x8x1xf32>
    %cst_24 = arith.constant dense<0xFF800000> : vector<4x1xf32>
    %48 = vector.multi_reduction <maximumf>, %47, %cst_24 [1] : vector<4x8x1xf32> to vector<4x1xf32>
    %49 = vector.shape_cast %48 : vector<4x1xf32> to vector<4x1x1xf32>
    %50 = vector.broadcast %49 : vector<4x1x1xf32> to vector<4x8x1xf32>
    %51 = arith.subf %47, %50 : vector<4x8x1xf32>
    %52 = math.exp %51 : vector<4x8x1xf32>
    %cst_25 = arith.constant dense<0.000000e+00> : vector<4x1xf32>
    %53 = vector.multi_reduction <add>, %52, %cst_25 [1] : vector<4x8x1xf32> to vector<4x1xf32>
    %54 = vector.shape_cast %53 : vector<4x1xf32> to vector<4x1x1xf32>
    %cst_26 = arith.constant 1.000000e+00 : f32
    %55 = vector.broadcast %cst_26 : f32 to vector<4x1x1xf32>
    %56 = arith.divf %55, %54 : vector<4x1x1xf32>
    %57 = vector.broadcast %56 : vector<4x1x1xf32> to vector<4x8x1xf32>
    %58 = arith.mulf %52, %57 : vector<4x8x1xf32>
    %59 = vector.broadcast %58 : vector<4x8x1xf32> to vector<4x8x32xf32>
    %60 = arith.mulf %59, %33 : vector<4x8x32xf32>
    %cst_27 = arith.constant dense<0.000000e+00> : vector<4x32xf32>
    %61 = vector.multi_reduction <add>, %60, %cst_27 [1] : vector<4x8x32xf32> to vector<4x32xf32>
    %c0_28 = arith.constant 0 : index
    %c0_29 = arith.constant 0 : index
    %62 = vector.load %arg7[%c0_28, %c0_29] : memref<32x32xf32, #tpu.memory_space<vmem>>, vector<32x32xf32>
    %cst_30 = arith.constant dense<0.000000e+00> : vector<4x32xf32>
    %63 = tpu.matmul %61, %62, %cst_30 {dimension_numbers = #tpu.dot_dimension_numbers<[1], [0], [0], [1], [0, 0, 1, 1], [], []>} : vector<4x32xf32>, vector<32x32xf32>, vector<4x32xf32> -> vector<4x32xf32>
    %c0_31 = arith.constant 0 : index
    %c0_32 = arith.constant 0 : index
    %64 = vector.load %arg8[%c0_31, %c0_32] : memref<1x32xf32, #tpu.memory_space<vmem>>, vector<1x32xf32>
    %65 = vector.broadcast %64 : vector<1x32xf32> to vector<4x32xf32>
    %66 = arith.addf %63, %65 : vector<4x32xf32>
    %cst_33 = arith.constant 0.000000e+00 : f32
    %67 = vector.broadcast %cst_33 : f32 to vector<4x32xf32>
    %68 = arith.maximumf %66, %67 : vector<4x32xf32>
    %c0_34 = arith.constant 0 : index
    %c0_35 = arith.constant 0 : index
    %69 = vector.load %arg9[%c0_34, %c0_35] : memref<32x128xf32, #tpu.memory_space<vmem>>, vector<32x128xf32>
    %cst_36 = arith.constant dense<0.000000e+00> : vector<4x128xf32>
    %70 = tpu.matmul %68, %69, %cst_36 {dimension_numbers = #tpu.dot_dimension_numbers<[1], [0], [0], [1], [0, 0, 1, 1], [], []>} : vector<4x32xf32>, vector<32x128xf32>, vector<4x128xf32> -> vector<4x128xf32>
    %c0_37 = arith.constant 0 : index
    %c0_38 = arith.constant 0 : index
    %71 = vector.load %arg10[%c0_37, %c0_38] : memref<1x128xf32, #tpu.memory_space<vmem>>, vector<1x128xf32>
    %72 = vector.broadcast %71 : vector<1x128xf32> to vector<4x128xf32>
    %73 = arith.addf %70, %72 : vector<4x128xf32>
    %74 = vector.shape_cast %73 : vector<4x128xf32> to vector<1x4x128xf32>
    %c0_39 = arith.constant 0 : index
    %c0_40 = arith.constant 0 : index
    %c0_41 = arith.constant 0 : index
    %75 = vector.load %arg11[%c0_39, %c0_40, %c0_41] : memref<1x4x128xf32, #tpu.memory_space<vmem>>, vector<1x4x128xf32>
    tpu.vector_store %arg11[%c0_39, %c0_40, %c0_41], %74 {strides = array<i32>} : memref<1x4x128xf32, #tpu.memory_space<vmem>>, vector<1x4x128xf32>,
    return
  }
  func.func @transform_0(%arg0: i32) -> (i32, i32, i32) {
    %c0_i32 = arith.constant 0 : i32
    %c0_i32_0 = arith.constant 0 : i32
    %c0_i32_1 = arith.constant 0 : i32
    return %arg0, %c0_i32, %c0_i32_0 : i32, i32, i32
  }
  func.func @transform_1(%arg0: i32) -> (i32, i32, i32) {
    %c0_i32 = arith.constant 0 : i32
    %c0_i32_0 = arith.constant 0 : i32
    %c0_i32_1 = arith.constant 0 : i32
    return %arg0, %c0_i32, %c0_i32_0 : i32, i32, i32
  }
  func.func @transform_2(%arg0: i32) -> (i32, i32, i32) {
    %c0_i32 = arith.constant 0 : i32
    %c0_i32_0 = arith.constant 0 : i32
    %c0_i32_1 = arith.constant 0 : i32
    return %arg0, %c0_i32, %c0_i32_0 : i32, i32, i32
  }
  func.func @transform_3(%arg0: i32) -> (i32, i32) {
    %c0_i32 = arith.constant 0 : i32
    %c0_i32_0 = arith.constant 0 : i32
    %c0_i32_1 = arith.constant 0 : i32
    return %c0_i32, %c0_i32_0 : i32, i32
  }
  func.func @transform_4(%arg0: i32) -> (i32, i32) {
    %c0_i32 = arith.constant 0 : i32
    %c0_i32_0 = arith.constant 0 : i32
    %c0_i32_1 = arith.constant 0 : i32
    return %c0_i32, %c0_i32_0 : i32, i32
  }
  func.func @transform_5(%arg0: i32) -> (i32, i32) {
    %c0_i32 = arith.constant 0 : i32
    %c0_i32_0 = arith.constant 0 : i32
    %c0_i32_1 = arith.constant 0 : i32
    return %c0_i32, %c0_i32_0 : i32, i32
  }
  func.func @transform_6(%arg0: i32) -> (i32, i32) {
    %c0_i32 = arith.constant 0 : i32
    %c0_i32_0 = arith.constant 0 : i32
    %c0_i32_1 = arith.constant 0 : i32
    return %c0_i32, %c0_i32_0 : i32, i32
  }
  func.func @transform_7(%arg0: i32) -> (i32, i32) {
    %c0_i32 = arith.constant 0 : i32
    %c0_i32_0 = arith.constant 0 : i32
    %c0_i32_1 = arith.constant 0 : i32
    return %c0_i32, %c0_i32_0 : i32, i32
  }
  func.func @transform_8(%arg0: i32) -> (i32, i32) {
    %c0_i32 = arith.constant 0 : i32
    %c0_i32_0 = arith.constant 0 : i32
    %c0_i32_1 = arith.constant 0 : i32
    return %c0_i32, %c0_i32_0 : i32, i32
  }
  func.func @transform_9(%arg0: i32) -> (i32, i32) {
    %c0_i32 = arith.constant 0 : i32
    %c0_i32_0 = arith.constant 0 : i32
    %c0_i32_1 = arith.constant 0 : i32
    return %c0_i32, %c0_i32_0 : i32, i32
  }
  func.func @transform_10(%arg0: i32) -> (i32, i32, i32) {
    %c0_i32 = arith.constant 0 : i32
    %c0_i32_0 = arith.constant 0 : i32
    %c0_i32_1 = arith.constant 0 : i32
    return %arg0, %c0_i32, %c0_i32_0 : i32, i32, i32
  }
}

</mosaic_0001>

<bundles_post_ra>
// kernel: tpu_custom_call.1
= control target key start
LH: loop header
LB: loop body
LE: loop exit
PB: predicated region body
PF: predicated region fallthrough
CT: control target
= control target key end

     0   :  { %15 = vsyncpa [#allocation3], 0  ;;  %s1846_s0 = inlined_call_operand.hbm [shape: f32[4,8,32], index: 0, kind: input, shape index: {}]   ;;  %s1847_s1 = inlined_call_operand.hbm [shape: f32[4,8,32], index: 1, kind: input, shape index: {}]   ;;  %s1848_s2 = inlined_call_operand.hbm [shape: f32[4,1,8], index: 2, kind: input, shape index: {}]   ;;  %s1849_s3 = inlined_call_operand.hbm [shape: f32[32,32], index: 3, kind: input, shape index: {}]   ;;  %s1850_s4 = inlined_call_operand.vmem [shape: f32[1,32], index: 4, kind: input, shape index: {}]   ;;  %s1851_s5 = inlined_call_operand.vmem [shape: f32[1,32], index: 5, kind: input, shape index: {}]   ;;  %s1852_s6 = inlined_call_operand.hbm [shape: f32[32,32], index: 6, kind: input, shape index: {}]   ;;  %s1853_s7 = inlined_call_operand.vmem [shape: f32[1,32], index: 7, kind: input, shape index: {}]   ;;  %s1854_s8 = inlined_call_operand.hbm [shape: f32[32,128], index: 8, kind: input, shape index: {}]   ;;  %s1855_s9 = inlined_call_operand.vmem [shape: f32[1,128], index: 9, kind: input, shape index: {}]   ;;  %s1856_s10 = inlined_call_operand.hbm [shape: f32[1,4,128], index: 10, kind: output, shape index: {}]  }
   0x1   :  { %16 = vsyncpa [#allocation6], 0 }
   0x2   :  { %17 = vsyncpa [#allocation9], 0 }
   0x3   :  { %18 = vsyncpa [#allocation12], 0 }
   0x4   :  { %19 = vsyncpa [#allocation4], 0  ;;  %s1611_s13 = smov [#allocation5]   ;;  %s1612_s15 = smov [#allocation8]  }
   0x5   :  { %s37_s14 = sshll.u32 %s1611_s13, 4  ;;  %s61_s16 = sshll.u32 %s1612_s15, 4  ;;  %s38_s14 = int_to_ptr.vmem [resolvable:$true] %s37_s14  ;;  %s62_s16 = int_to_ptr.vmem [resolvable:$true] %s61_s16 }
   0x6   :  { %s1469_s17 = scalar_lea.vmem %s38_s14, 512  ;;  %p1474_p1 = scmp.lt.s32.totalorder %s38_s14, %s38_s14 }
   0x7   :  { %p1470_p0 = scmp.ne.s32.totalorder %s38_s14, %s1469_s17  ;;  %p1475_p2 = scmp.lt.s32.totalorder %s1469_s17, %s1469_s17 }
   0x9   :  { %p1476_p3 = por %p1475_p2, %p1474_p1 }
   0xb   :  { %p1477_p4 = pnand %p1476_p3, %p1470_p0 }
   0xd   :  { %1480 = shalt.err (!%p1477_p4)
}
   0xe   :  { %s1613_s18 = smov 128   ;;  %s1614_s19 = smov 8  }
   0xf   :  { %43 = dma.hbm_to_vmem [thread:$0]  %s1847_s1, 512, %s38_s14, [#allocation6], %s1613_s18, %s1613_s18, %s1614_s19  }
  0x10   :  { %s1489_s22 = scalar_lea.vmem %s62_s16, 512  ;;  %p1494_p6 = scmp.lt.s32.totalorder %s62_s16, %s62_s16 }
  0x11   :  { %p1490_p5 = scmp.ne.s32.totalorder %s62_s16, %s1489_s22  ;;  %p1495_p7 = scmp.lt.s32.totalorder %s1489_s22, %s1489_s22 }
  0x13   :  { %p1496_p8 = por %p1495_p7, %p1494_p6 }
  0x15   :  { %p1497_p9 = pnand %p1496_p8, %p1490_p5 }
  0x17   :  { %1500 = shalt.err (!%p1497_p9)
}
  0x18   :  { %67 = dma.hbm_to_vmem [thread:$0]  %s1849_s3, 512, %s62_s16, [#allocation9], %s1613_s18, %s1613_s18, %s1614_s19  }
  0x19   :  { %s1615_s25 = smov [#allocation2]   ;;  %s1616_s27 = smov [#allocation7]  }
  0x1a   :  { %s25_s26 = sshll.u32 %s1615_s25, 4  ;;  %s49_s28 = sshll.u32 %s1616_s27, 4  ;;  %s26_s26 = int_to_ptr.vmem [resolvable:$true] %s25_s26  ;;  %s50_s28 = int_to_ptr.vmem [resolvable:$true] %s49_s28 }
  0x1b   :  { %s1509_s1 = scalar_lea.vmem %s26_s26, 512  ;;  %p1514_p11 = scmp.lt.s32.totalorder %s26_s26, %s26_s26 }
  0x1c   :  { %p1510_p10 = scmp.ne.s32.totalorder %s26_s26, %s1509_s1  ;;  %p1515_p12 = scmp.lt.s32.totalorder %s1509_s1, %s1509_s1 }
  0x1e   :  { %p1516_p13 = por %p1515_p12, %p1514_p11 }
  0x20   :  { %p1517_p0 = pnand %p1516_p13, %p1510_p10 }
  0x22   :  { %1520 = shalt.err (!%p1517_p0)
}
  0x23   :  { %31 = dma.hbm_to_vmem [thread:$0]  %s1846_s0, 512, %s26_s26, [#allocation3], %s1613_s18, %s1613_s18, %s1614_s19  }
  0x24   :  { %s1529_s3 = scalar_lea.vmem %s50_s28, 64  ;;  %p1534_p2 = scmp.lt.s32.totalorder %s50_s28, %s50_s28 }
  0x25   :  { %p1530_p1 = scmp.ne.s32.totalorder %s50_s28, %s1529_s3  ;;  %p1535_p3 = scmp.lt.s32.totalorder %s1529_s3, %s1529_s3 }
  0x27   :  { %p1536_p4 = por %p1535_p3, %p1534_p2 }
  0x29   :  { %p1537_p5 = pnand %p1536_p4, %p1530_p1 }
  0x2b   :  { %1540 = shalt.err (!%p1537_p5)
}
  0x2c   :  { %s1617_s11 = smov 16   ;;  %s1618_s12 = smov 1  }
  0x2d   :  { %55 = dma.hbm_to_vmem [thread:$0]  %s1848_s2, 64, %s50_s28, [#allocation6], %s1617_s11, %s1617_s11, %s1618_s12  }
  0x2e   :  { %s1619_s15 = smov [#allocation10]   ;;  %s1620_s17 = smov [#allocation11]  }
  0x2f   :  { %s77_s16 = sshll.u32 %s1619_s15, 4  ;;  %s91_s20 = sshll.u32 %s1620_s17, 4  ;;  %s78_s16 = int_to_ptr.vmem [resolvable:$true] %s77_s16  ;;  %s92_s20 = int_to_ptr.vmem [resolvable:$true] %s91_s20 }
  0x30   :  { %s1549_s0 = scalar_lea.vmem %s78_s16, 512  ;;  %p1554_p7 = scmp.lt.s32.totalorder %s78_s16, %s78_s16 }
  0x31   :  { %p1550_p6 = scmp.ne.s32.totalorder %s78_s16, %s1549_s0  ;;  %p1555_p8 = scmp.lt.s32.totalorder %s1549_s0, %s1549_s0 }
  0x33   :  { %p1556_p9 = por %p1555_p8, %p1554_p7 }
  0x35   :  { %p1557_p10 = pnand %p1556_p9, %p1550_p6 }
  0x37   :  { %1560 = shalt.err (!%p1557_p10)
}
  0x38   :  { %83 = dma.hbm_to_vmem [thread:$0]  %s1852_s6, 512, %s78_s16, [#allocation9], %s1613_s18, %s1613_s18, %s1614_s19  }
  0x39   :  { %s1569_s2 = scalar_lea.vmem %s92_s20, 512  ;;  %p1574_p12 = scmp.lt.s32.totalorder %s92_s20, %s92_s20 }
  0x3a   :  { %p1570_p11 = scmp.ne.s32.totalorder %s92_s20, %s1569_s2  ;;  %p1575_p13 = scmp.lt.s32.totalorder %s1569_s2, %s1569_s2 }
  0x3c   :  { %p1576_p0 = por %p1575_p13, %p1574_p12 }
  0x3e   :  { %p1577_p1 = pnand %p1576_p0, %p1570_p11 }
  0x40   :  { %1580 = shalt.err (!%p1577_p1)
}
  0x41   :  { %97 = dma.hbm_to_vmem [thread:$0]  %s1854_s8, 512, %s92_s20, [#allocation12], %s1613_s18, %s1613_s18, %s1614_s19  }
  0x42   :  { %1601 = dma.done.wait [#allocation3], 512  }
  0x43   :  { %1602 = vsyncadd [#allocation3], 4294966784 }
  0x44   :  { %1603 = dma.done.wait [#allocation6], 576  }
  0x45   :  { %1604 = vsyncadd [#allocation6], 4294966720 }
  0x46   :  { %1605 = dma.done.wait [#allocation9], 1024  }
  0x47   :  { %1606 = vsyncadd [#allocation9], 4294966272 }
  0x48   :  { %1607 = dma.done.wait [#allocation12], 512  }
  0x49   :  { %1608 = vsyncadd [#allocation12], 4294966784  ;;  %v130_v0 = vlaneseq  ;;  %v1621_v1 = vmov 0.0   ;;  %vm1622_vm0 = vmmov 0   ;;  %vm186_vm2 = vcmask 261120   ;;  %v122_v4 = vld [vmem:[#allocation5] sm:$0xff] }
  0x4a   :  { %1332 = vmatprep.subr.mxu1 %v1621_v1  ;;  %1334 = vmatprep.mubr.msk.f32.mxu1 %vm1622_vm0, %v1621_v1  ;;  %v118_v6 = vld [vmem:[#allocation2] sm:$0xff]  ;;  %v1720_v7 = vld [vmem:[#allocation5 + $0x10] sm:$0xff]  ;;  %v123_v8 = vld [vmem:[#allocation5 + $0x8] sm:$0xff]  ;;  %vm165_vm3 = vcmask 64512   ;;  %vm1089_vm8 = vcmask 1041409   ;;  %vm1091_vm9 = vcmask 1042434  }
  0x4b   :  { %1342 = vmatprep.subr.mxu0 %v1621_v1  ;;  %1344 = vmatprep.mubr.msk.f32.mxu0 %vm1622_vm0, %v1621_v1  ;;  %v131_v2 = vshrl.u32 %v130_v0, 7  ;;  %v133_v3 = vand.u32 127, %v130_v0  ;;  %v120_v9 = vld [vmem:[#allocation2 + $0x10] sm:$0xff]  ;;  %v1272_v10 = vld [vmem:[#allocation7] ss:$0 sm:$0xff]  ;;  %v119_v18 = vld [vmem:[#allocation2 + $0x8] sm:$0xff] }
  0x4c   :  { %1333 = vmatpush3.xpose.msk.msra.mxu1 %vm186_vm2, %v122_v4  ;;  %1343 = vmatpush3.xpose.msk.msra.mxu0 %vm186_vm2, %v1720_v7  ;;  %v1274_v12 = vld [vmem:[#allocation7 + $0x2] ss:$0 sm:$0xff]  ;;  %v1273_v13 = vld [vmem:[#allocation7 + $0x1] ss:$0 sm:$0xff]  ;;  %v1275_v14 = vld [vmem:[#allocation7 + $0x3] ss:$0 sm:$0xff] }
  0x4d   :  { %vm134_vm1 = vcmp.eq.s32.totalorder %v131_v2, %v133_v3  ;;  %1337 = vmatprep.subr.mxu1 %v1621_v1  ;;  %1352 = vmatprep.subr.mxu0 %v1621_v1  ;;  %v1733_v20 = vld [vmem:[#allocation5 + $0x18] sm:$0xff]  ;;  %vm1093_vm10 = vcmask 1043459   ;;  %s1623_s27 = smov [#allocation13]  }
  0x4e   :  { %v1271_v5 = vsel %vm134_vm1, 1.0, %v1621_v1  ;;  %v121_v24 = vld [vmem:[#allocation2 + $0x18] sm:$0xff]  ;;  %s1259_s28 = sshll.u32 %s1623_s27, 4  ;;  %s1260_s28 = int_to_ptr.vmem [resolvable:$true] %s1259_s28 }
  0x4f   :  { %v161_v11 = vmul.f32 %v1272_v10, %v1271_v5  ;;  %1335 = vmatmul.mubr.msk.f32.vlgmr.msra.gmra.mxu1 %vm186_vm2, %v118_v6  ;;  %v163_v15 = vmul.f32 %v1274_v12, %v1271_v5  ;;  %v162_v16 = vmul.f32 %v1273_v13, %v1271_v5  ;;  %v164_v17 = vmul.f32 %v1275_v14, %v1271_v5  ;;  %v834_v13 = vld [vmem:[#allocation8 + $0x18] sm:$0xff]  ;;  %s1581_s1 = scalar_lea.vmem %s1260_s28, 64  ;;  %p1586_p3 = scmp.lt.s32.totalorder %s1260_s28, %s1260_s28 }
  0x50   :  { %1338 = vmatpush3.xpose.msk.msra.mxu1 %vm186_vm2, %v123_v8  ;;  %1339 = vmatprep.mubr.msk.f32.mxu1 %vm1622_vm0, %v1621_v1  ;;  %p1582_p2 = scmp.ne.s32.totalorder %s1260_s28, %s1581_s1  ;;  %p1587_p4 = scmp.lt.s32.totalorder %s1581_s1, %s1581_s1 }
  0x51   :  { %v166_v19 = vsel %vm165_vm3, %v161_v11, 0.0  ;;  %1345 = vmatmul.mubr.msk.f32.vlgmr.msra.gmra.mxu0 %vm186_vm2, %v120_v9  ;;  %1347 = vmatprep.subr.mxu1 %v1621_v1  ;;  %v172_v21 = vsel %vm165_vm3, %v163_v15, 0.0  ;;  %v169_v22 = vsel %vm165_vm3, %v162_v16, 0.0  ;;  %v175_v23 = vsel %vm165_vm3, %v164_v17, 0.0 }
  0x52   :  { %167 = vadd.xlane.f32.xlu0 %v166_v19  ;;  %173 = vadd.xlane.f32.xlu1 %v172_v21  ;;  %v832_v21 = vld [vmem:[#allocation8 + $0x8] sm:$0xff]  ;;  %p1588_p5 = por %p1587_p4, %p1586_p3 }
  0x53   :  { %1340 = vmatmul.mubr.msk.f32.vlgmr.msra.gmra.mxu1 %vm186_vm2, %v119_v18  ;;  %1353 = vmatpush3.msra.mxu0 %v122_v4  ;;  %v833_v18 = vld [vmem:[#allocation8 + $0x10] sm:$0xff] }
  0x54   :  { %1348 = vmatpush3.xpose.msk.msra.mxu1 %vm186_vm2, %v1733_v20  ;;  %1349 = vmatprep.mubr.msk.f32.mxu1 %vm1622_vm0, %v1621_v1  ;;  %p1589_p6 = pnand %p1588_p5, %p1582_p2 }
  0x55   :  { %1354 = vmatprep.mubr.msk.f32.mxu0 %vm1622_vm0, %v1621_v1  ;;  %1357 = vmatprep.subr.mxu1 %v1621_v1 }
  0x56   :  { %170 = vadd.xlane.f32.xlu0 %v169_v22  ;;  %176 = vadd.xlane.f32.xlu1 %v175_v23  ;;  %v831_v22 = vld [vmem:[#allocation8] sm:$0xff] }
  0x57   :  { %1350 = vmatmul.mubr.msk.f32.vlgmr.msra.gmra.mxu1 %vm186_vm2, %v121_v24  ;;  %1362 = vmatprep.subr.mxu0 %v1621_v1 }
  0x58   :  { %1358 = vmatpush3.msra.mxu1 %v123_v8  ;;  %1359 = vmatprep.mubr.msk.f32.mxu1 %vm1622_vm0, %v1621_v1 }
  0x59   :  { %1367 = vmatprep.subr.mxu1 %v1621_v1 }
  0xdb   :  { %v168_v25 = vpop.xlane.xlu0 %167  ;;  %v174_v26 = vpop.xlane.xlu1 %173 }
  0xdc   :  { %vm178_vm4 = vcmp.gt.f32.partialorder %v168_v25, 0.5  ;;  %vm180_vm5 = vcmp.gt.f32.partialorder %v174_v26, 0.5 }
  0xdd   :  { %v1752_v28 = vsel %vm178_vm4, -inf, %v1621_v1  ;;  %v1755_v30 = vsel %vm180_vm5, -inf, %v1621_v1 }
  0xdf   :  { %v171_v27 = vpop.xlane.xlu0 %170  ;;  %v177_v31 = vpop.xlane.xlu1 %176 }
  0xe0   :  { %vm179_vm6 = vcmp.gt.f32.partialorder %v171_v27, 0.5  ;;  %vm181_vm7 = vcmp.gt.f32.partialorder %v177_v31, 0.5 }
  0xe1   :  { %v1759_v35 = vsel %vm179_vm6, -inf, %v1621_v1  ;;  %v1766_v43 = vsel %vm181_vm7, -inf, %v1621_v1 }
 0x10f   :  { %v259_v29 = vpop.f32.mrf.mxu1 }
 0x110   :  { %v260_v32 = vadd.f32 %v259_v29, %v1752_v28 }
 0x111   :  { %v1336_v33 = vpop.f32.mrf.mxu1  ;;  %v411_v34 = vpop.f32.mrf.mxu0 }
 0x112   :  { %v412_v36 = vadd.f32 %v411_v34, %v1755_v30  ;;  %v491_v37 = vsel %vm165_vm3, %v260_v32, -inf }
 0x113   :  { %492 = vmax.xlane.f32.xlu0 %v491_v37  ;;  %v335_v38 = vpop.f32.mrf.mxu1  ;;  %v1346_v39 = vpop.f32.mrf.mxu0 }
 0x114   :  { %v336_v40 = vadd.f32 %v335_v38, %v1759_v35  ;;  %v497_v41 = vsel %vm165_vm3, %v412_v36, -inf }
 0x115   :  { %v1341_v42 = vpop.f32.mrf.mxu1 }
 0x116   :  { %v494_v44 = vsel %vm165_vm3, %v336_v40, -inf  ;;  %v1293_v42 = vld [vmem:[%s1851_s5] ss:$0 sm:$0xff] }
 0x117   :  { %498 = vmax.xlane.f32.xlu0 %v497_v41  ;;  %495 = vmax.xlane.f32.xlu1 %v494_v44  ;;  %v487_v45 = vpop.f32.mrf.mxu1 }
 0x118   :  { %v488_v46 = vadd.f32 %v487_v45, %v1766_v43 }
 0x119   :  { %v1351_v47 = vpop.f32.mrf.mxu1 }
 0x11a   :  { %v500_v48 = vsel %vm165_vm3, %v488_v46, -inf }
 0x11b   :  { %501 = vmax.xlane.f32.xlu1 %v500_v48 }
 0x19c   :  { %v493_v49 = vpop.xlane.xlu0 %492 }
 0x19d   :  { %v503_v50 = vsub.f32 %v260_v32, %v493_v49  ;;  %v1288_v32 = vld [vmem:[%s1850_s4] ss:$0 sm:$0xff] }
 0x19f   :  { %v507_v51 = vmul.f32 1.442695, %v503_v50 }
 0x1a0   :  { %v499_v52 = vpop.xlane.xlu0 %498  ;;  %v496_v53 = vpop.xlane.xlu1 %495 }
 0x1a1   :  { %1421 = vpow2.f32 %v507_v51  ;;  %v505_v54 = vsub.f32 %v412_v36, %v499_v52  ;;  %v504_v55 = vsub.f32 %v336_v40, %v496_v53 }
 0x1a3   :  { %v511_v56 = vmul.f32 1.442695, %v505_v54  ;;  %v509_v57 = vmul.f32 1.442695, %v504_v55 }
 0x1a4   :  { %v502_v58 = vpop.xlane.xlu1 %501 }
 0x1a5   :  { %1423 = vpow2.f32 %v511_v56  ;;  %v506_v59 = vsub.f32 %v488_v46, %v502_v58  ;;  %v1077_v56 = vld [vmem:[#allocation10 + $0x18] sm:$0xff]  ;;  %v1075_v58 = vld [vmem:[#allocation10 + $0x8] sm:$0xff] }
 0x1a6   :  { %1425 = vpow2.f32 %v509_v57  ;;  %v1076_v57 = vld [vmem:[#allocation10 + $0x10] sm:$0xff] }
 0x1a7   :  { %v513_v60 = vmul.f32 1.442695, %v506_v59  ;;  %v1074_v59 = vld [vmem:[#allocation10] sm:$0xff] }
 0x1a9   :  { %1427 = vpow2.f32 %v513_v60  ;;  %v1171_v60 = vld [vmem:[#allocation11 + $0x18] sm:$0xff] }
 0x1ae   :  { %v1422_v61 = vpop.eup %1421 }
 0x1af   :  { %v515_v62 = vsel %vm165_vm3, %v1422_v61, 0.0 }
 0x1b0   :  { %516 = vadd.xlane.f32.xlu0 %v515_v62 }
 0x1b2   :  { %v1424_v63 = vpop.eup %1423 }
 0x1b3   :  { %v1426_v0 = vpop.eup %1425  ;;  %v521_v2 = vsel %vm165_vm3, %v1424_v63, 0.0 }
 0x1b4   :  { %522 = vadd.xlane.f32.xlu0 %v521_v2  ;;  %v518_v3 = vsel %vm165_vm3, %v1426_v0, 0.0 }
 0x1b5   :  { %519 = vadd.xlane.f32.xlu1 %v518_v3 }
 0x1b6   :  { %v1428_v4 = vpop.eup %1427 }
 0x1b7   :  { %v524_v5 = vsel %vm165_vm3, %v1428_v4, 0.0 }
 0x1b9   :  { %525 = vadd.xlane.f32.xlu1 %v524_v5 }
 0x239   :  { %v517_v6 = vpop.xlane.xlu0 %516 }
 0x23a   :  { %1429 = vrcp.f32 %v517_v6 }
 0x23d   :  { %v523_v8 = vpop.xlane.xlu0 %522 }
 0x23e   :  { %1431 = vrcp.f32 %v523_v8  ;;  %v520_v9 = vpop.xlane.xlu1 %519 }
 0x23f   :  { %1433 = vrcp.f32 %v520_v9 }
 0x242   :  { %v526_v10 = vpop.xlane.xlu1 %525 }
 0x243   :  { %1435 = vrcp.f32 %v526_v10 }
 0x247   :  { %v1430_v11 = vpop.eup %1429 }
 0x248   :  { %v535_v12 = vmul.f32 %v1430_v11, %v1422_v61 }
 0x24a   :  { %1355 = vmatmul.mubr.msk.f32.vlgmr.msra.gmra.mxu0 %vm165_vm3, %v535_v12 }
 0x24b   :  { %v1432_v14 = vpop.eup %1431  ;;  %1363 = vmatpush3.msra.mxu0 %v1720_v7  ;;  %1364 = vmatprep.mubr.msk.f32.mxu0 %vm1622_vm0, %v1621_v1 }
 0x24c   :  { %v1434_v15 = vpop.eup %1433  ;;  %v537_v16 = vmul.f32 %v1432_v14, %v1424_v63  ;;  %1372 = vmatprep.subr.mxu0 %v834_v13 }
 0x24d   :  { %v536_v17 = vmul.f32 %v1434_v15, %v1426_v0 }
 0x24e   :  { %1365 = vmatmul.mubr.msk.f32.vlgmr.msra.gmra.mxu0 %vm165_vm3, %v537_v16 }
 0x24f   :  { %1360 = vmatmul.mubr.msk.f32.vlgmr.msra.gmra.mxu1 %vm165_vm3, %v536_v17  ;;  %1373 = vmatpush3.msra.mxu0 %v834_v13 }
 0x250   :  { %v1436_v19 = vpop.eup %1435  ;;  %1368 = vmatpush3.msra.mxu1 %v1733_v20  ;;  %1369 = vmatprep.mubr.msk.f32.mxu1 %vm1622_vm0, %v1621_v1 }
 0x251   :  { %v538_v7 = vmul.f32 %v1436_v19, %v1428_v4  ;;  %1374 = vmatprep.subr.mxu0 %v833_v18  ;;  %1386 = vmatprep.subr.mxu1 %v1621_v1 }
 0x252   :  { %1375 = vmatpush3.msra.mxu0 %v833_v18 }
 0x253   :  { %1370 = vmatmul.mubr.msk.f32.vlgmr.msra.gmra.mxu1 %vm165_vm3, %v538_v7  ;;  %1376 = vmatprep.subr.mxu0 %v832_v21 }
 0x254   :  { %1394 = vmatprep.mubr.msk.f32.mxu1 %vm1622_vm0, %v1621_v1  ;;  %1377 = vmatpush3.msra.mxu0 %v832_v21 }
 0x255   :  { %1378 = vmatprep.subr.mxu0 %v831_v22  ;;  %1387 = vmatpush3.msra.mxu1 %v1077_v56 }
 0x256   :  { %1379 = vmatpush3.msra.mxu0 %v831_v22  ;;  %1388 = vmatprep.subr.mxu1 %v1621_v1 }
 0x257   :  { %1397 = vmatprep.subr.mxu0 %v1621_v1  ;;  %1389 = vmatpush3.msra.mxu1 %v1076_v57 }
 0x258   :  { %1390 = vmatprep.subr.mxu1 %v1621_v1 }
 0x259   :  { %1391 = vmatpush3.msra.mxu1 %v1075_v58 }
 0x25a   :  { %1392 = vmatprep.subr.mxu1 %v1621_v1 }
 0x25b   :  { %1393 = vmatpush3.msra.mxu1 %v1074_v59 }
 0x30a   :  { %v1789_v20 = vpop.f32.mrf.mxu0 }
 0x30b   :  { %1380 = vmatprep.mubr.msk.f32.mxu0 %vm186_vm2, %v1789_v20 }
 0x30c   :  { %v1356_v23 = vpop.f32.mrf.mxu0 }
 0x30e   :  { %v1793_v24 = vpop.f32.mrf.mxu0 }
 0x30f   :  { %v1795_v25 = vpop.f32.mrf.mxu1 }
 0x310   :  { %1381 = vmatmul.mubr.msk.f32.vlgmr.msra.gmra.mxu0 %vm186_vm2, %v1795_v25  ;;  %v1366_v26 = vpop.f32.mrf.mxu0 }
 0x311   :  { %v1361_v27 = vpop.f32.mrf.mxu1  ;;  %1383 = vmatprep.mubr.msk.f32.mxu0 %vm186_vm2, %v1793_v24  ;;  %1398 = vmatpush3.msra.mxu0 %v1171_v60 }
 0x312   :  { %1399 = vmatprep.subr.mxu0 %v1621_v1 }
 0x313   :  { %v1801_v29 = vpop.f32.mrf.mxu1 }
 0x314   :  { %1384 = vmatmul.mubr.msk.f32.gmra.mxu0 %vm186_vm2, %v1801_v29 }
 0x315   :  { %v1371_v31 = vpop.f32.mrf.mxu1  ;;  %1405 = vmatprep.mubr.msk.f32.mxu0 %vm1622_vm0, %v1621_v1 }
 0x3d0   :  { %v1382_v33 = vpop.f32.mrf.mxu0 }
 0x3d1   :  { %v926_v34 = vadd.f32 %v1382_v33, %v1288_v32 }
 0x3d2   :  { %v920_v36 = vpop.f32.mrf.mxu0 }
 0x3d3   :  { %1437 = vtanh.f32 %v926_v34  ;;  %v921_v37 = vadd.f32 %v1288_v32, %v920_v36 }
 0x3d4   :  { %v1385_v38 = vpop.f32.mrf.mxu0 }
 0x3d5   :  { %1439 = vtanh.f32 %v921_v37  ;;  %v936_v39 = vadd.f32 %v1385_v38, %v1288_v32 }
 0x3d6   :  { %v930_v40 = vpop.f32.mrf.mxu0 }
 0x3d7   :  { %1441 = vtanh.f32 %v936_v39  ;;  %v931_v41 = vadd.f32 %v1288_v32, %v930_v40 }
 0x3d9   :  { %1443 = vtanh.f32 %v931_v41 }
 0x3e0   :  { %v1438_v44 = vpop.eup %1437 }
 0x3e1   :  { %v951_v45 = vmul.f32 %v1438_v44, %v1293_v42 }
 0x3e2   :  { %v1440_v46 = vpop.eup %1439 }
 0x3e3   :  { %v957_v47 = vsel %vm186_vm2, %v951_v45, 0.0  ;;  %v950_v48 = vmul.f32 %v1440_v46, %v1293_v42 }
 0x3e4   :  { %v1442_v49 = vpop.eup %1441  ;;  %958 = vadd.xlane.f32.xlu1 %v957_v47 }
 0x3e5   :  { %v954_v50 = vsel %vm186_vm2, %v950_v48, 0.0  ;;  %v953_v51 = vmul.f32 %v1442_v49, %v1293_v42 }
 0x3e6   :  { %v1444_v52 = vpop.eup %1443  ;;  %955 = vadd.xlane.f32.xlu0 %v954_v50 }
 0x3e7   :  { %v963_v53 = vsel %vm186_vm2, %v953_v51, 0.0  ;;  %v952_v54 = vmul.f32 %v1444_v52, %v1293_v42 }
 0x3e8   :  { %964 = vadd.xlane.f32.xlu1 %v963_v53 }
 0x3e9   :  { %v960_v55 = vsel %vm186_vm2, %v952_v54, 0.0 }
 0x3ea   :  { %961 = vadd.xlane.f32.xlu0 %v960_v55 }
 0x46d   :  { %v959_v61 = vpop.xlane.xlu1 %958 }
 0x46e   :  { %v967_v62 = vadd.f32 %v959_v61, %v1759_v35 }
 0x46f   :  { %v956_v63 = vpop.xlane.xlu0 %955 }
 0x470   :  { %v976_v0 = vrot.slane %v967_v62, 4  ;;  %v966_v2 = vadd.f32 %v956_v63, %v1752_v28 }
 0x471   :  { %v965_v3 = vpop.xlane.xlu1 %964 }
 0x472   :  { %v977_v4 = vmax.f32 %v967_v62, %v976_v0  ;;  %v970_v5 = vrot.slane %v966_v2, 4  ;;  %v969_v6 = vadd.f32 %v965_v3, %v1766_v43 }
 0x473   :  { %v962_v8 = vpop.xlane.xlu0 %961 }
 0x474   :  { %v978_v9 = vrot.slane %v977_v4, 2  ;;  %v971_v10 = vmax.f32 %v966_v2, %v970_v5  ;;  %v988_v11 = vrot.slane %v969_v6, 4  ;;  %v968_v12 = vadd.f32 %v962_v8, %v1755_v30 }
 0x476   :  { %v979_v13 = vmax.f32 %v977_v4, %v978_v9  ;;  %v972_v14 = vrot.slane %v971_v10, 2  ;;  %v989_v15 = vmax.f32 %v969_v6, %v988_v11  ;;  %v982_v16 = vrot.slane %v968_v12, 4 }
 0x478   :  { %v980_v35 = vrot.slane %v979_v13, 1  ;;  %v973_v17 = vmax.f32 %v971_v10, %v972_v14  ;;  %v990_v18 = vrot.slane %v989_v15, 2  ;;  %v983_v19 = vmax.f32 %v968_v12, %v982_v16 }
 0x47a   :  { %v981_v28 = vmax.f32 %v979_v13, %v980_v35  ;;  %v974_v7 = vrot.slane %v973_v17, 1  ;;  %v991_v21 = vmax.f32 %v989_v15, %v990_v18  ;;  %v984_v22 = vrot.slane %v983_v19, 2 }
 0x47c   :  { %v995_v23 = vsub.f32 %v967_v62, %v981_v28  ;;  %v975_v43 = vmax.f32 %v973_v17, %v974_v7  ;;  %v992_v26 = vrot.slane %v991_v21, 1  ;;  %v985_v27 = vmax.f32 %v983_v19, %v984_v22 }
 0x47e   :  { %v1000_v31 = vmul.f32 1.442695, %v995_v23  ;;  %v994_v32 = vsub.f32 %v966_v2, %v975_v43  ;;  %v993_v33 = vmax.f32 %v991_v21, %v992_v26  ;;  %v986_v30 = vrot.slane %v985_v27, 1 }
 0x480   :  { %1445 = vpow2.f32 %v1000_v31  ;;  %v998_v34 = vmul.f32 1.442695, %v994_v32  ;;  %v997_v36 = vsub.f32 %v969_v6, %v993_v33  ;;  %v987_v37 = vmax.f32 %v985_v27, %v986_v30 }
 0x482   :  { %1447 = vpow2.f32 %v998_v34  ;;  %v1004_v38 = vmul.f32 1.442695, %v997_v36  ;;  %v996_v39 = vsub.f32 %v968_v12, %v987_v37 }
 0x484   :  { %1449 = vpow2.f32 %v1004_v38  ;;  %v1002_v40 = vmul.f32 1.442695, %v996_v39 }
 0x486   :  { %1451 = vpow2.f32 %v1002_v40 }
 0x48d   :  { %v1446_v41 = vpop.eup %1445 }
 0x48e   :  { %v1012_v42 = vrot.slane %v1446_v41, 4 }
 0x48f   :  { %v1448_v44 = vpop.eup %1447 }
 0x490   :  { %v1013_v45 = vadd.f32 %v1446_v41, %v1012_v42  ;;  %v1006_v46 = vrot.slane %v1448_v44, 4 }
 0x491   :  { %v1450_v47 = vpop.eup %1449 }
 0x492   :  { %v1014_v48 = vrot.slane %v1013_v45, 2  ;;  %v1007_v49 = vadd.f32 %v1448_v44, %v1006_v46  ;;  %v1024_v50 = vrot.slane %v1450_v47, 4 }
 0x493   :  { %v1452_v51 = vpop.eup %1451 }
 0x494   :  { %v1015_v52 = vadd.f32 %v1014_v48, %v1013_v45  ;;  %v1008_v53 = vrot.slane %v1007_v49, 2  ;;  %v1025_v54 = vadd.f32 %v1450_v47, %v1024_v50  ;;  %v1018_v55 = vrot.slane %v1452_v51, 4  ;;  %v1170_v50 = vld [vmem:[#allocation11 + $0x10] sm:$0xff] }
 0x495   :  { %1400 = vmatpush3.msra.mxu0 %v1170_v50 }
 0x496   :  { %v1009_v56 = vadd.f32 %v1008_v53, %v1007_v49  ;;  %v1019_v57 = vadd.f32 %v1452_v51, %v1018_v55  ;;  %v1016_v58 = vrot.slane %v1015_v52, 1  ;;  %v1026_v59 = vrot.slane %v1025_v54, 2  ;;  %1401 = vmatprep.subr.mxu0 %v1621_v1  ;;  %v1294_v53 = vld [vmem:[%s1853_s7] ss:$0 sm:$0xff] }
 0x498   :  { %v1020_v60 = vrot.slane %v1019_v57, 2  ;;  %v1010_v61 = vrot.slane %v1009_v56, 1  ;;  %v1017_v62 = vadd.f32 %v1016_v58, %v1015_v52  ;;  %v1027_v63 = vadd.f32 %v1026_v59, %v1025_v54  ;;  %v1168_v52 = vld [vmem:[#allocation11] sm:$0xff]  ;;  %v1296_v58 = vld [vmem:[%s1855_s9] ss:$0 sm:$0xff] }
 0x49a   :  { %v1011_v0 = vadd.f32 %v1010_v61, %v1009_v56  ;;  %v1021_v2 = vadd.f32 %v1020_v60, %v1019_v57  ;;  %v1028_v3 = vrot.slane %v1027_v63, 1  ;;  %1453 = vrcp.f32 %v1017_v62 }
 0x49c   :  { %v1022_v4 = vrot.slane %v1021_v2, 1  ;;  %v1029_v5 = vadd.f32 %v1028_v3, %v1027_v63  ;;  %1455 = vrcp.f32 %v1011_v0 }
 0x49e   :  { %v1023_v6 = vadd.f32 %v1022_v4, %v1021_v2  ;;  %1457 = vrcp.f32 %v1029_v5 }
 0x4a0   :  { %1459 = vrcp.f32 %v1023_v6 }
 0x4a7   :  { %v1454_v8 = vpop.eup %1453 }
 0x4a8   :  { %v1039_v9 = vmul.f32 %v1454_v8, %v1446_v41 }
 0x4a9   :  { %v1456_v10 = vpop.eup %1455 }
 0x4aa   :  { %v1038_v11 = vmul.f32 %v1456_v10, %v1448_v44  ;;  %v1043_v12 = vmul.f32 %v1039_v9, %v1795_v25 }
 0x4ab   :  { %v1458_v13 = vpop.eup %1457 }
 0x4ac   :  { %v1041_v14 = vmul.f32 %v1458_v13, %v1450_v47  ;;  %v1042_v15 = vmul.f32 %v1038_v11, %v1789_v20  ;;  %v1053_v16 = vsel %vm186_vm2, %v1043_v12, 0.0 }
 0x4ad   :  { %v1460_v35 = vpop.eup %1459  ;;  %v1054_v17 = vrot.slane %v1053_v16, 4 }
 0x4ae   :  { %v1040_v18 = vmul.f32 %v1460_v35, %v1452_v51  ;;  %v1045_v19 = vmul.f32 %v1041_v14, %v1801_v29  ;;  %v1046_v28 = vsel %vm186_vm2, %v1042_v15, 0.0  ;;  %v1169_v51 = vld [vmem:[#allocation11 + $0x8] sm:$0xff] }
 0x4af   :  { %v1047_v7 = vrot.slane %v1046_v28, 4  ;;  %v1055_v21 = vadd.f32 %v1054_v17, %v1053_v16  ;;  %1402 = vmatpush3.msra.mxu0 %v1169_v51 }
 0x4b0   :  { %v1044_v22 = vmul.f32 %v1040_v18, %v1793_v24  ;;  %v1067_v23 = vsel %vm186_vm2, %v1045_v19, 0.0  ;;  %1403 = vmatprep.subr.mxu0 %v1621_v1 }
 0x4b1   :  { %v1048_v25 = vadd.f32 %v1047_v7, %v1046_v28  ;;  %v1056_v43 = vrot.slane %v1055_v21, 2  ;;  %v1068_v26 = vrot.slane %v1067_v23, 4  ;;  %1404 = vmatpush3.msra.mxu0 %v1168_v52 }
 0x4b2   :  { %v1060_v20 = vsel %vm186_vm2, %v1044_v22, 0.0 }
 0x4b3   :  { %v1049_v27 = vrot.slane %v1048_v25, 2  ;;  %v1061_v31 = vrot.slane %v1060_v20, 4  ;;  %v1069_v32 = vadd.f32 %v1068_v26, %v1067_v23  ;;  %v1057_v33 = vadd.f32 %v1056_v43, %v1055_v21 }
 0x4b5   :  { %v1050_v30 = vadd.f32 %v1049_v27, %v1048_v25  ;;  %v1062_v34 = vadd.f32 %v1061_v31, %v1060_v20  ;;  %v1070_v29 = vrot.slane %v1069_v32, 2  ;;  %v1058_v39 = vrot.slane %v1057_v33, 1 }
 0x4b7   :  { %v1051_v36 = vrot.slane %v1050_v30, 1  ;;  %v1063_v37 = vrot.slane %v1062_v34, 2  ;;  %v1071_v38 = vadd.f32 %v1070_v29, %v1069_v32  ;;  %v1059_v44 = vadd.f32 %v1058_v39, %v1057_v33 }
 0x4b9   :  { %v1064_v40 = vadd.f32 %v1063_v37, %v1062_v34  ;;  %v1052_v24 = vadd.f32 %v1051_v36, %v1050_v30  ;;  %v1072_v41 = vrot.slane %v1071_v38, 1 }
 0x4bb   :  { %v1065_v42 = vrot.slane %v1064_v40, 1  ;;  %v1073_v46 = vadd.f32 %v1072_v41, %v1071_v38  ;;  %v1090_v47 = vsel %vm1089_vm8, %v1059_v44, %v1052_v24 }
 0x4bd   :  { %v1066_v45 = vadd.f32 %v1065_v42, %v1064_v40 }
 0x4bf   :  { %v1092_v48 = vsel %vm1091_vm9, %v1066_v45, %v1090_v47 }
 0x4c0   :  { %v1094_v49 = vsel %vm1093_vm10, %v1073_v46, %v1092_v48 }
 0x4c1   :  { %1395 = vmatmul.mubr.msk.f32.vlgmr.msra.gmra.mxu1 %vm186_vm2, %v1094_v49 }
 0x581   :  { %v1163_v54 = vpop.f32.mrf.mxu1 }
 0x582   :  { %v1164_v55 = vadd.f32 %v1294_v53, %v1163_v54 }
 0x583   :  { %v1396_v56 = vpop.f32.mrf.mxu1 }
 0x584   :  { %v1167_v57 = vmax.f32 %v1164_v55, 0.0 }
 0x586   :  { %1406 = vmatmul.mubr.msk.f32.vlgmr.msra.gmra.mxu0 %vm186_vm2, %v1167_v57 }
 0x646   :  { %v1248_v59 = vpop.f32.mrf.mxu0 }
 0x647   :  { %v1249_v1 = vadd.f32 %v1296_v58, %v1248_v59 }
 0x648   :  { %v1407_v60 = vpop.f32.mrf.mxu0 }
 0x649   :  { %1252 = vst [vmem:[#allocation13] sm:$0xf] %v1249_v1 }
 0x64a   :  { %1592 = shalt.err (!%p1589_p6)
}
 0x64b   :  { %1262 = dma.vmem_to_hbm [thread:$0]  %s1260_s28, 64, %s1856_s10, [#allocation4]  }
 0x64c   :  { %1609 = dma.done.wait [#allocation4], 64  }
 0x64d   :  { %1610 = vsyncadd [#allocation4], 4294967232 }
 0x64e   :  { %1266 = vsyncpa [#allocation3], 1 }
 0x64f   :  { %1267 = vsyncpa [#allocation6], 1 }
 0x650   :  { %1268 = vsyncpa [#allocation9], 1 }
 0x651   :  { %1269 = vsyncpa [#allocation12], 1 }
 0x652   :  { %1270 = vsyncpa [#allocation4], 1 }

</bundles_post_ra>
